<compile_context>
chip_gen: v7x
topology: tpu7x:2x2x1
jax: 0.10.0
libtpu: 0.0.40
codegen_flags: <defaults>
</compile_context>

<pallas_src>
import jax
import jax.numpy as jnp
from jax.experimental import pallas as pl
from jax.experimental.pallas import tpu as pltpu


def _round_up(x: int, m: int) -> int:
    return ((x + m - 1) // m) * m


def _vmem_budget():
    """Returns (double-buffered block budget, vmem_limit_bytes) per TPU generation."""
    cap = 64 * 1024 * 1024
    try:
        info = pltpu.get_tpu_info()
        cap = getattr(info, "vmem_capacity_bytes", cap) or cap
    except Exception:  # no TPU info available -> stay conservative (v7x-safe)
        pass
    if cap >= 128 * 1024 * 1024:                      # v5e / v6e
        return 64 * 1024 * 1024, 96 * 1024 * 1024
    return 12 * 1024 * 1024, 32 * 1024 * 1024         # v7x (64 MiB VMEM)


# ----------------------------------------------------------------------------
# Small-channel path: VPU FMAs, modes on the 128-lane axis, native weight layout.
# ----------------------------------------------------------------------------
def _vpu_kernel(xr_ref, xi_ref, wr_ref, wi_ref, yr_ref, yi_ref):
    # xr/xi: (Cin, B, TM)   wr/wi: (Cin, Cout, TM)   yr/yi: (Cout, B, TM)
    # Complex channel mixing as unrolled VPU FMAs; every HBM byte is useful
    # (no channel padding) and the MXU is skipped entirely.
    cin = xr_ref.shape[0]
    cout = wr_ref.shape[1]
    f32 = jnp.float32
    xr = [xr_ref[i].astype(f32) for i in range(cin)]        # each (B, TM)
    xi = [xi_ref[i].astype(f32) for i in range(cin)]
    for o in range(cout):
        yr = None
        yi = None
        for i in range(cin):
            wr_io = wr_ref[i, pl.ds(o, 1), :].astype(f32)    # (1, TM), bcast over B
            wi_io = wi_ref[i, pl.ds(o, 1), :].astype(f32)
            tr = xr[i] * wr_io - xi[i] * wi_io
            ti = xr[i] * wi_io + xi[i] * wr_io
            yr = tr if yr is None else yr + tr
            yi = ti if yi is None else yi + ti
        yr_ref[o] = yr
        yi_ref[o] = yi


def _spectral_mul_vpu(xr, xi, wr, wi):
    """xr/xi: (Cin, B, modes); wr/wi: (Cin, Cout, modes) in the NATIVE torch layout.
    Returns yr, yi: (Cout, B, modes) float32."""
    cin, b, modes = xr.shape
    cout = wr.shape[1]
    budget, vmem_limit = _vmem_budget()
    in_bytes = jnp.dtype(xr.dtype).itemsize
    per_mode = 2 * (cin * b + cin * cout) * in_bytes + 2 * (cout * b) * 4

    if modes <= 128 or 2 * modes * per_mode <= budget:
        tm, modes_p = modes, modes                   # single full-extent block
    else:
        tm = max(128, (budget // (2 * per_mode) // 128) * 128)
        modes_p = _round_up(modes, tm)

    if modes_p != modes:
        pad = ((0, 0), (0, 0), (0, modes_p - modes))
        xr, xi = jnp.pad(xr, pad), jnp.pad(xi, pad)
        wr, wi = jnp.pad(wr, pad), jnp.pad(wi, pad)

    x_spec = pl.BlockSpec((cin, b, tm), lambda k: (0, 0, k))
    w_spec = pl.BlockSpec((cin, cout, tm), lambda k: (0, 0, k))
    y_spec = pl.BlockSpec((cout, b, tm), lambda k: (0, 0, k))
    y_shape = jax.ShapeDtypeStruct((cout, b, modes_p), jnp.float32)

    yr, yi = pl.pallas_call(
        _vpu_kernel,
        out_shape=(y_shape, y_shape),
        grid_spec=pltpu.PrefetchScalarGridSpec(
            num_scalar_prefetch=0,
            grid=(modes_p // tm,),
            in_specs=[x_spec, x_spec, w_spec, w_spec],
            out_specs=(y_spec, y_spec),
        ),
        compiler_params=pltpu.CompilerParams(
            dimension_semantics=("parallel",),
            vmem_limit_bytes=vmem_limit,
        ),
    )(xr, xi, wr, wi)
    return yr[:, :, :modes], yi[:, :, :modes]


# ----------------------------------------------------------------------------
# Large-channel path: batched MXU matmuls, modes (and optionally Cout) gridded.
# ----------------------------------------------------------------------------
def _mxu_kernel(xr_ref, xi_ref, wr_ref, wi_ref, yr_ref, yi_ref):
    # xr/xi: (TK, B, Cin)   wr/wi: (TK, Cin, TN)   yr/yi: (TK, B, TN)
    xr, xi = xr_ref[...], xi_ref[...]
    wr, wi = wr_ref[...], wi_ref[...]
    f32 = jnp.float32
    rr = jnp.einsum("kbi,kio->kbo", xr, wr, preferred_element_type=f32)
    ii = jnp.einsum("kbi,kio->kbo", xi, wi, preferred_element_type=f32)
    ri = jnp.einsum("kbi,kio->kbo", xr, wi, preferred_element_type=f32)
    ir = jnp.einsum("kbi,kio->kbo", xi, wr, preferred_element_type=f32)
    yr_ref[...] = (rr - ii).astype(yr_ref.dtype)
    yi_ref[...] = (ri + ir).astype(yi_ref.dtype)


def _spectral_mul_mxu(xr, xi, wr, wi):
    """xr/xi: (modes, B, Cin); wr/wi: (modes, Cin, Cout).
    Returns yr, yi: (modes, B, Cout) float32."""
    modes, b, cin = xr.shape
    cout = wr.shape[2]
    budget, vmem_limit = _vmem_budget()
    in_bytes = jnp.dtype(xr.dtype).itemsize

    def mode_block_bytes(tn_):
        # bytes of one mode's worth of kernel blocks (xr+xi, wr+wi, yr+yi)
        return 2 * (b * cin + cin * tn_) * in_bytes + 2 * (b * tn_) * 4

    # Optional Cout tiling (only when it divides into 128-multiples): keeps the
    # weight block inside the VMEM budget on v7x instead of forcing tk -> 1 / OOM.
    tn = cout
    if cout % 128 == 0:
        for cand in (cout, 2048, 1024, 512, 256, 128):
            if cand <= cout and cout % cand == 0 and 2 * mode_block_bytes(cand) <= budget:
                tn = cand
                break
        else:
            tn = 128

    tk = max(1, min(modes, budget // (2 * mode_block_bytes(tn))))
    steps = pl.cdiv(modes, tk)
    if steps > 1 and steps % 2 == 1:     # prefer an even step count (v7x megacore)
        steps += 1
        tk = pl.cdiv(modes, steps)
    modes_p = tk * steps

    if modes_p != modes:
        pad = ((0, modes_p - modes), (0, 0), (0, 0))
        xr, xi = jnp.pad(xr, pad), jnp.pad(xi, pad)
        wr, wi = jnp.pad(wr, pad), jnp.pad(wi, pad)

    x_spec = pl.BlockSpec((tk, b, cin), lambda k, j: (k, 0, 0))
    w_spec = pl.BlockSpec((tk, cin, tn), lambda k, j: (k, 0, j))
    y_spec = pl.BlockSpec((tk, b, tn), lambda k, j: (k, 0, j))
    y_shape = jax.ShapeDtypeStruct((modes_p, b, cout), jnp.float32)

    yr, yi = pl.pallas_call(
        _mxu_kernel,
        out_shape=(y_shape, y_shape),
        grid_spec=pltpu.PrefetchScalarGridSpec(
            num_scalar_prefetch=0,
            grid=(steps, cout // tn),
            in_specs=[x_spec, x_spec, w_spec, w_spec],
            out_specs=(y_spec, y_spec),
        ),
        compiler_params=pltpu.CompilerParams(
            dimension_semantics=("parallel", "parallel"),
            vmem_limit_bytes=vmem_limit,
        ),
    )(xr, xi, wr, wi)
    return yr[:modes], yi[:modes]


# ----------------------------------------------------------------------------
# Forward pass matching the PyTorch SpectralConv1d.
# ----------------------------------------------------------------------------
def spectral_conv1d(x, w_real, w_imag, modes, *, compute_dtype=jnp.bfloat16):
    """x: (B, Cin, N) f32; w_real/w_imag: (Cin, Cout, modes) f32 (real/imag of the
    complex weight). compute_dtype is the kernel-input dtype (bf16 halves HBM
    traffic on the bandwidth-bound weight stream; accumulation is always f32).
    Returns (B, Cout, N) f32."""
    B, Cin, N = x.shape
    Cout = w_real.shape[1]

    # TODO(synk): rfft/irfft have no Pallas TPU primitive; they stay in XLA.
    x_ft = jnp.fft.rfft(x, axis=-1)                      # (B, Cin, N//2+1) c64
    xk = x_ft[:, :, :modes]
    xr = jnp.real(xk)                                    # (B, Cin, modes) f32
    xi = jnp.imag(xk)

    if Cin <= 16 and Cout <= 16:
        # VPU path: modes on the lane axis, weights consumed in their native
        # (Cin, Cout, modes) layout -> zero repacking, zero channel padding.
        yr, yi = _spectral_mul_vpu(
            jnp.transpose(xr, (1, 0, 2)).astype(compute_dtype),   # (Cin, B, modes)
            jnp.transpose(xi, (1, 0, 2)).astype(compute_dtype),
            w_real.astype(compute_dtype),                         # (Cin, Cout, modes)
            w_imag.astype(compute_dtype),
        )                                                # (Cout, B, modes) f32
        y = jnp.transpose(yr + 1j * yi, (1, 0, 2)).astype(jnp.complex64)
    else:
        # MXU path.
        # TODO(synk): when the layer is called repeatedly (training / many FNO
        # layers), hoist these per-call weight transposes/casts out of the step
        # and cache the frequency-major bf16 weights.
        yr, yi = _spectral_mul_mxu(
            jnp.transpose(xr, (2, 0, 1)).astype(compute_dtype),   # (modes, B, Cin)
            jnp.transpose(xi, (2, 0, 1)).astype(compute_dtype),
            jnp.transpose(w_real, (2, 0, 1)).astype(compute_dtype),  # (modes, Cin, Cout)
            jnp.transpose(w_imag, (2, 0, 1)).astype(compute_dtype),
        )                                                # (modes, B, Cout) f32
        y = jnp.transpose(yr + 1j * yi, (1, 2, 0)).astype(jnp.complex64)

    n_freq = N // 2 + 1
    out_ft = jnp.zeros((B, Cout, n_freq), dtype=jnp.complex64)
    out_ft = out_ft.at[:, :, :modes].set(y)              # (B, Cout, n_freq)
    return jnp.fft.irfft(out_ft, n=N, axis=-1)           # (B, Cout, N) f32


def _reference(x, w_real, w_imag, modes):
    """Pure-JAX reference of the exact PyTorch semantics (complex64)."""
    B, Cin, N = x.shape
    Cout = w_real.shape[1]
    w_c = (w_real + 1j * w_imag).astype(jnp.complex64)
    x_ft = jnp.fft.rfft(x, axis=-1)
    y = jnp.einsum("bix,iox->box", x_ft[:, :, :modes], w_c)
    out_ft = jnp.zeros((B, Cout, N // 2 + 1), dtype=jnp.complex64)
    out_ft = out_ft.at[:, :, :modes].set(y)
    return jnp.fft.irfft(out_ft, n=N, axis=-1)


if __name__ == "__main__":
    def make_case(key, B, Cin, Cout, N, modes):
        kx, kwr, kwi = jax.random.split(key, 3)
        scale = 1.0 / (Cin * Cout)
        w_real = scale * jax.random.normal(kwr, (Cin, Cout, modes), dtype=jnp.float32)
        w_imag = scale * jax.random.normal(kwi, (Cin, Cout, modes), dtype=jnp.float32)
        x = jax.random.normal(kx, (B, Cin, N), dtype=jnp.float32)
        return x, w_real, w_imag, modes

    k1, k2 = jax.random.split(jax.random.PRNGKey(0))

    # --- Small-channel config from the example module (VPU path). ---
    x, w_real, w_imag, modes = make_case(k1, B=2, Cin=4, Cout=4, N=16, modes=6)
    ref = _reference(x, w_real, w_imag, modes)
    ref_scale = float(jnp.max(jnp.abs(ref))) + 1e-6

    out_f32 = jax.block_until_ready(
        spectral_conv1d(x, w_real, w_imag, modes, compute_dtype=jnp.float32))
    assert out_f32.shape == (2, 4, 16)
    assert jnp.allclose(out_f32, ref, atol=1e-4, rtol=1e-4), "f32 VPU path mismatch"

    out_bf16 = jax.block_until_ready(spectral_conv1d(x, w_real, w_imag, modes))
    err = float(jnp.max(jnp.abs(out_bf16 - ref)))
    assert err <= 3e-2 * ref_scale + 1e-3, f"bf16 VPU path mismatch (err={err})"

    # --- Larger-channel config (MXU path). ---
    x2, w2r, w2i, modes2 = make_case(k2, B=2, Cin=32, Cout=32, N=64, modes=12)
    ref2 = _reference(x2, w2r, w2i, modes2)
    ref2_scale = float(jnp.max(jnp.abs(ref2))) + 1e-6
    out2 = jax.block_until_ready(spectral_conv1d(x2, w2r, w2i, modes2))
    assert out2.shape == (2, 32, 64)
    err2 = float(jnp.max(jnp.abs(out2 - ref2)))
    assert err2 <= 3e-2 * ref2_scale + 1e-3, f"bf16 MXU path mismatch (err={err2})"

    print("KERNEL_OK")
</pallas_src>

<mosaic_0001>
module attributes {stable_mosaic.version = 11 : i64} {
  func.func @_vpu_kernel(%arg0: i32, %arg1: memref<4x2x6xf32, #tpu.memory_space<vmem>>, %arg2: memref<4x2x6xf32, #tpu.memory_space<vmem>>, %arg3: memref<4x4x6xf32, #tpu.memory_space<vmem>>, %arg4: memref<4x4x6xf32, #tpu.memory_space<vmem>>, %arg5: memref<4x2x6xf32, #tpu.memory_space<vmem>>, %arg6: memref<4x2x6xf32, #tpu.memory_space<vmem>>) attributes {dimension_semantics = [#tpu.dimension_semantics<parallel>], iteration_bounds = array<i64: 1>, scalar_prefetch = 0 : i64, scratch_operands = 0 : i64, tpu.core_type = #tpu.core_type<tc>, window_params = [{transform_indices = @transform_0, window_bounds = array<i64: 4, 2, 6>}, {transform_indices = @transform_1, window_bounds = array<i64: 4, 2, 6>}, {transform_indices = @transform_2, window_bounds = array<i64: 4, 4, 6>}, {transform_indices = @transform_3, window_bounds = array<i64: 4, 4, 6>}, {transform_indices = @transform_4, window_bounds = array<i64: 4, 2, 6>}, {transform_indices = @transform_5, window_bounds = array<i64: 4, 2, 6>}]} {
    %c0 = arith.constant 0 : index
    %c0_0 = arith.constant 0 : index
    %c0_1 = arith.constant 0 : index
    %0 = vector.load %arg1[%c0, %c0_0, %c0_1] : memref<4x2x6xf32, #tpu.memory_space<vmem>>, vector<1x2x6xf32>
    %1 = vector.shape_cast %0 : vector<1x2x6xf32> to vector<2x6xf32>
    %c1 = arith.constant 1 : index
    %c0_2 = arith.constant 0 : index
    %c0_3 = arith.constant 0 : index
    %2 = vector.load %arg1[%c1, %c0_2, %c0_3] : memref<4x2x6xf32, #tpu.memory_space<vmem>>, vector<1x2x6xf32>
    %3 = vector.shape_cast %2 : vector<1x2x6xf32> to vector<2x6xf32>
    %c2 = arith.constant 2 : index
    %c0_4 = arith.constant 0 : index
    %c0_5 = arith.constant 0 : index
    %4 = vector.load %arg1[%c2, %c0_4, %c0_5] : memref<4x2x6xf32, #tpu.memory_space<vmem>>, vector<1x2x6xf32>
    %5 = vector.shape_cast %4 : vector<1x2x6xf32> to vector<2x6xf32>
    %c3 = arith.constant 3 : index
    %c0_6 = arith.constant 0 : index
    %c0_7 = arith.constant 0 : index
    %6 = vector.load %arg1[%c3, %c0_6, %c0_7] : memref<4x2x6xf32, #tpu.memory_space<vmem>>, vector<1x2x6xf32>
    %7 = vector.shape_cast %6 : vector<1x2x6xf32> to vector<2x6xf32>
    %c0_8 = arith.constant 0 : index
    %c0_9 = arith.constant 0 : index
    %c0_10 = arith.constant 0 : index
    %8 = vector.load %arg2[%c0_8, %c0_9, %c0_10] : memref<4x2x6xf32, #tpu.memory_space<vmem>>, vector<1x2x6xf32>
    %9 = vector.shape_cast %8 : vector<1x2x6xf32> to vector<2x6xf32>
    %c1_11 = arith.constant 1 : index
    %c0_12 = arith.constant 0 : index
    %c0_13 = arith.constant 0 : index
    %10 = vector.load %arg2[%c1_11, %c0_12, %c0_13] : memref<4x2x6xf32, #tpu.memory_space<vmem>>, vector<1x2x6xf32>
    %11 = vector.shape_cast %10 : vector<1x2x6xf32> to vector<2x6xf32>
    %c2_14 = arith.constant 2 : index
    %c0_15 = arith.constant 0 : index
    %c0_16 = arith.constant 0 : index
    %12 = vector.load %arg2[%c2_14, %c0_15, %c0_16] : memref<4x2x6xf32, #tpu.memory_space<vmem>>, vector<1x2x6xf32>
    %13 = vector.shape_cast %12 : vector<1x2x6xf32> to vector<2x6xf32>
    %c3_17 = arith.constant 3 : index
    %c0_18 = arith.constant 0 : index
    %c0_19 = arith.constant 0 : index
    %14 = vector.load %arg2[%c3_17, %c0_18, %c0_19] : memref<4x2x6xf32, #tpu.memory_space<vmem>>, vector<1x2x6xf32>
    %15 = vector.shape_cast %14 : vector<1x2x6xf32> to vector<2x6xf32>
    %c0_20 = arith.constant 0 : index
    %c0_21 = arith.constant 0 : index
    %c0_22 = arith.constant 0 : index
    %16 = vector.load %arg3[%c0_20, %c0_21, %c0_22] : memref<4x4x6xf32, #tpu.memory_space<vmem>>, vector<1x1x6xf32>
    %17 = vector.shape_cast %16 : vector<1x1x6xf32> to vector<1x6xf32>
    %c0_23 = arith.constant 0 : index
    %c0_24 = arith.constant 0 : index
    %c0_25 = arith.constant 0 : index
    %18 = vector.load %arg4[%c0_23, %c0_24, %c0_25] : memref<4x4x6xf32, #tpu.memory_space<vmem>>, vector<1x1x6xf32>
    %19 = vector.shape_cast %18 : vector<1x1x6xf32> to vector<1x6xf32>
    %20 = vector.broadcast %17 : vector<1x6xf32> to vector<2x6xf32>
    %21 = arith.mulf %1, %20 : vector<2x6xf32>
    %22 = vector.broadcast %19 : vector<1x6xf32> to vector<2x6xf32>
    %23 = arith.mulf %9, %22 : vector<2x6xf32>
    %24 = arith.subf %21, %23 : vector<2x6xf32>
    %25 = vector.broadcast %19 : vector<1x6xf32> to vector<2x6xf32>
    %26 = arith.mulf %1, %25 : vector<2x6xf32>
    %27 = vector.broadcast %17 : vector<1x6xf32> to vector<2x6xf32>
    %28 = arith.mulf %9, %27 : vector<2x6xf32>
    %29 = arith.addf %26, %28 : vector<2x6xf32>
    %c1_26 = arith.constant 1 : index
    %c0_27 = arith.constant 0 : index
    %c0_28 = arith.constant 0 : index
    %30 = vector.load %arg3[%c1_26, %c0_27, %c0_28] : memref<4x4x6xf32, #tpu.memory_space<vmem>>, vector<1x1x6xf32>
    %31 = vector.shape_cast %30 : vector<1x1x6xf32> to vector<1x6xf32>
    %c1_29 = arith.constant 1 : index
    %c0_30 = arith.constant 0 : index
    %c0_31 = arith.constant 0 : index
    %32 = vector.load %arg4[%c1_29, %c0_30, %c0_31] : memref<4x4x6xf32, #tpu.memory_space<vmem>>, vector<1x1x6xf32>
    %33 = vector.shape_cast %32 : vector<1x1x6xf32> to vector<1x6xf32>
    %34 = vector.broadcast %31 : vector<1x6xf32> to vector<2x6xf32>
    %35 = arith.mulf %3, %34 : vector<2x6xf32>
    %36 = vector.broadcast %33 : vector<1x6xf32> to vector<2x6xf32>
    %37 = arith.mulf %11, %36 : vector<2x6xf32>
    %38 = arith.subf %35, %37 : vector<2x6xf32>
    %39 = vector.broadcast %33 : vector<1x6xf32> to vector<2x6xf32>
    %40 = arith.mulf %3, %39 : vector<2x6xf32>
    %41 = vector.broadcast %31 : vector<1x6xf32> to vector<2x6xf32>
    %42 = arith.mulf %11, %41 : vector<2x6xf32>
    %43 = arith.addf %40, %42 : vector<2x6xf32>
    %44 = arith.addf %24, %38 : vector<2x6xf32>
    %45 = arith.addf %29, %43 : vector<2x6xf32>
    %c2_32 = arith.constant 2 : index
    %c0_33 = arith.constant 0 : index
    %c0_34 = arith.constant 0 : index
    %46 = vector.load %arg3[%c2_32, %c0_33, %c0_34] : memref<4x4x6xf32, #tpu.memory_space<vmem>>, vector<1x1x6xf32>
    %47 = vector.shape_cast %46 : vector<1x1x6xf32> to vector<1x6xf32>
    %c2_35 = arith.constant 2 : index
    %c0_36 = arith.constant 0 : index
    %c0_37 = arith.constant 0 : index
    %48 = vector.load %arg4[%c2_35, %c0_36, %c0_37] : memref<4x4x6xf32, #tpu.memory_space<vmem>>, vector<1x1x6xf32>
    %49 = vector.shape_cast %48 : vector<1x1x6xf32> to vector<1x6xf32>
    %50 = vector.broadcast %47 : vector<1x6xf32> to vector<2x6xf32>
    %51 = arith.mulf %5, %50 : vector<2x6xf32>
    %52 = vector.broadcast %49 : vector<1x6xf32> to vector<2x6xf32>
    %53 = arith.mulf %13, %52 : vector<2x6xf32>
    %54 = arith.subf %51, %53 : vector<2x6xf32>
    %55 = vector.broadcast %49 : vector<1x6xf32> to vector<2x6xf32>
    %56 = arith.mulf %5, %55 : vector<2x6xf32>
    %57 = vector.broadcast %47 : vector<1x6xf32> to vector<2x6xf32>
    %58 = arith.mulf %13, %57 : vector<2x6xf32>
    %59 = arith.addf %56, %58 : vector<2x6xf32>
    %60 = arith.addf %44, %54 : vector<2x6xf32>
    %61 = arith.addf %45, %59 : vector<2x6xf32>
    %c3_38 = arith.constant 3 : index
    %c0_39 = arith.constant 0 : index
    %c0_40 = arith.constant 0 : index
    %62 = vector.load %arg3[%c3_38, %c0_39, %c0_40] : memref<4x4x6xf32, #tpu.memory_space<vmem>>, vector<1x1x6xf32>
    %63 = vector.shape_cast %62 : vector<1x1x6xf32> to vector<1x6xf32>
    %c3_41 = arith.constant 3 : index
    %c0_42 = arith.constant 0 : index
    %c0_43 = arith.constant 0 : index
    %64 = vector.load %arg4[%c3_41, %c0_42, %c0_43] : memref<4x4x6xf32, #tpu.memory_space<vmem>>, vector<1x1x6xf32>
    %65 = vector.shape_cast %64 : vector<1x1x6xf32> to vector<1x6xf32>
    %66 = vector.broadcast %63 : vector<1x6xf32> to vector<2x6xf32>
    %67 = arith.mulf %7, %66 : vector<2x6xf32>
    %68 = vector.broadcast %65 : vector<1x6xf32> to vector<2x6xf32>
    %69 = arith.mulf %15, %68 : vector<2x6xf32>
    %70 = arith.subf %67, %69 : vector<2x6xf32>
    %71 = vector.broadcast %65 : vector<1x6xf32> to vector<2x6xf32>
    %72 = arith.mulf %7, %71 : vector<2x6xf32>
    %73 = vector.broadcast %63 : vector<1x6xf32> to vector<2x6xf32>
    %74 = arith.mulf %15, %73 : vector<2x6xf32>
    %75 = arith.addf %72, %74 : vector<2x6xf32>
    %76 = arith.addf %60, %70 : vector<2x6xf32>
    %77 = arith.addf %61, %75 : vector<2x6xf32>
    %c0_44 = arith.constant 0 : index
    %c0_45 = arith.constant 0 : index
    %c0_46 = arith.constant 0 : index
    %78 = vector.load %arg5[%c0_44, %c0_45, %c0_46] : memref<4x2x6xf32, #tpu.memory_space<vmem>>, vector<1x2x6xf32>
    %79 = vector.shape_cast %78 : vector<1x2x6xf32> to vector<2x6xf32>
    %80 = vector.shape_cast %76 : vector<2x6xf32> to vector<1x2x6xf32>
    tpu.vector_store %arg5[%c0_44, %c0_45, %c0_46], %80 {strides = array<i32>} : memref<4x2x6xf32, #tpu.memory_space<vmem>>, vector<1x2x6xf32>,
    %c0_47 = arith.constant 0 : index
    %c0_48 = arith.constant 0 : index
    %c0_49 = arith.constant 0 : index
    %81 = vector.load %arg6[%c0_47, %c0_48, %c0_49] : memref<4x2x6xf32, #tpu.memory_space<vmem>>, vector<1x2x6xf32>
    %82 = vector.shape_cast %81 : vector<1x2x6xf32> to vector<2x6xf32>
    %83 = vector.shape_cast %77 : vector<2x6xf32> to vector<1x2x6xf32>
    tpu.vector_store %arg6[%c0_47, %c0_48, %c0_49], %83 {strides = array<i32>} : memref<4x2x6xf32, #tpu.memory_space<vmem>>, vector<1x2x6xf32>,
    %c0_50 = arith.constant 0 : index
    %c1_51 = arith.constant 1 : index
    %c0_52 = arith.constant 0 : index
    %84 = vector.load %arg3[%c0_50, %c1_51, %c0_52] : memref<4x4x6xf32, #tpu.memory_space<vmem>>, vector<1x1x6xf32>
    %85 = vector.shape_cast %84 : vector<1x1x6xf32> to vector<1x6xf32>
    %c0_53 = arith.constant 0 : index
    %c1_54 = arith.constant 1 : index
    %c0_55 = arith.constant 0 : index
    %86 = vector.load %arg4[%c0_53, %c1_54, %c0_55] : memref<4x4x6xf32, #tpu.memory_space<vmem>>, vector<1x1x6xf32>
    %87 = vector.shape_cast %86 : vector<1x1x6xf32> to vector<1x6xf32>
    %88 = vector.broadcast %85 : vector<1x6xf32> to vector<2x6xf32>
    %89 = arith.mulf %1, %88 : vector<2x6xf32>
    %90 = vector.broadcast %87 : vector<1x6xf32> to vector<2x6xf32>
    %91 = arith.mulf %9, %90 : vector<2x6xf32>
    %92 = arith.subf %89, %91 : vector<2x6xf32>
    %93 = vector.broadcast %87 : vector<1x6xf32> to vector<2x6xf32>
    %94 = arith.mulf %1, %93 : vector<2x6xf32>
    %95 = vector.broadcast %85 : vector<1x6xf32> to vector<2x6xf32>
    %96 = arith.mulf %9, %95 : vector<2x6xf32>
    %97 = arith.addf %94, %96 : vector<2x6xf32>
    %c1_56 = arith.constant 1 : index
    %c1_57 = arith.constant 1 : index
    %c0_58 = arith.constant 0 : index
    %98 = vector.load %arg3[%c1_56, %c1_57, %c0_58] : memref<4x4x6xf32, #tpu.memory_space<vmem>>, vector<1x1x6xf32>
    %99 = vector.shape_cast %98 : vector<1x1x6xf32> to vector<1x6xf32>
    %c1_59 = arith.constant 1 : index
    %c1_60 = arith.constant 1 : index
    %c0_61 = arith.constant 0 : index
    %100 = vector.load %arg4[%c1_59, %c1_60, %c0_61] : memref<4x4x6xf32, #tpu.memory_space<vmem>>, vector<1x1x6xf32>
    %101 = vector.shape_cast %100 : vector<1x1x6xf32> to vector<1x6xf32>
    %102 = vector.broadcast %99 : vector<1x6xf32> to vector<2x6xf32>
    %103 = arith.mulf %3, %102 : vector<2x6xf32>
    %104 = vector.broadcast %101 : vector<1x6xf32> to vector<2x6xf32>
    %105 = arith.mulf %11, %104 : vector<2x6xf32>
    %106 = arith.subf %103, %105 : vector<2x6xf32>
    %107 = vector.broadcast %101 : vector<1x6xf32> to vector<2x6xf32>
    %108 = arith.mulf %3, %107 : vector<2x6xf32>
    %109 = vector.broadcast %99 : vector<1x6xf32> to vector<2x6xf32>
    %110 = arith.mulf %11, %109 : vector<2x6xf32>
    %111 = arith.addf %108, %110 : vector<2x6xf32>
    %112 = arith.addf %92, %106 : vector<2x6xf32>
    %113 = arith.addf %97, %111 : vector<2x6xf32>
    %c2_62 = arith.constant 2 : index
    %c1_63 = arith.constant 1 : index
    %c0_64 = arith.constant 0 : index
    %114 = vector.load %arg3[%c2_62, %c1_63, %c0_64] : memref<4x4x6xf32, #tpu.memory_space<vmem>>, vector<1x1x6xf32>
    %115 = vector.shape_cast %114 : vector<1x1x6xf32> to vector<1x6xf32>
    %c2_65 = arith.constant 2 : index
    %c1_66 = arith.constant 1 : index
    %c0_67 = arith.constant 0 : index
    %116 = vector.load %arg4[%c2_65, %c1_66, %c0_67] : memref<4x4x6xf32, #tpu.memory_space<vmem>>, vector<1x1x6xf32>
    %117 = vector.shape_cast %116 : vector<1x1x6xf32> to vector<1x6xf32>
    %118 = vector.broadcast %115 : vector<1x6xf32> to vector<2x6xf32>
    %119 = arith.mulf %5, %118 : vector<2x6xf32>
    %120 = vector.broadcast %117 : vector<1x6xf32> to vector<2x6xf32>
    %121 = arith.mulf %13, %120 : vector<2x6xf32>
    %122 = arith.subf %119, %121 : vector<2x6xf32>
    %123 = vector.broadcast %117 : vector<1x6xf32> to vector<2x6xf32>
    %124 = arith.mulf %5, %123 : vector<2x6xf32>
    %125 = vector.broadcast %115 : vector<1x6xf32> to vector<2x6xf32>
    %126 = arith.mulf %13, %125 : vector<2x6xf32>
    %127 = arith.addf %124, %126 : vector<2x6xf32>
    %128 = arith.addf %112, %122 : vector<2x6xf32>
    %129 = arith.addf %113, %127 : vector<2x6xf32>
    %c3_68 = arith.constant 3 : index
    %c1_69 = arith.constant 1 : index
    %c0_70 = arith.constant 0 : index
    %130 = vector.load %arg3[%c3_68, %c1_69, %c0_70] : memref<4x4x6xf32, #tpu.memory_space<vmem>>, vector<1x1x6xf32>
    %131 = vector.shape_cast %130 : vector<1x1x6xf32> to vector<1x6xf32>
    %c3_71 = arith.constant 3 : index
    %c1_72 = arith.constant 1 : index
    %c0_73 = arith.constant 0 : index
    %132 = vector.load %arg4[%c3_71, %c1_72, %c0_73] : memref<4x4x6xf32, #tpu.memory_space<vmem>>, vector<1x1x6xf32>
    %133 = vector.shape_cast %132 : vector<1x1x6xf32> to vector<1x6xf32>
    %134 = vector.broadcast %131 : vector<1x6xf32> to vector<2x6xf32>
    %135 = arith.mulf %7, %134 : vector<2x6xf32>
    %136 = vector.broadcast %133 : vector<1x6xf32> to vector<2x6xf32>
    %137 = arith.mulf %15, %136 : vector<2x6xf32>
    %138 = arith.subf %135, %137 : vector<2x6xf32>
    %139 = vector.broadcast %133 : vector<1x6xf32> to vector<2x6xf32>
    %140 = arith.mulf %7, %139 : vector<2x6xf32>
    %141 = vector.broadcast %131 : vector<1x6xf32> to vector<2x6xf32>
    %142 = arith.mulf %15, %141 : vector<2x6xf32>
    %143 = arith.addf %140, %142 : vector<2x6xf32>
    %144 = arith.addf %128, %138 : vector<2x6xf32>
    %145 = arith.addf %129, %143 : vector<2x6xf32>
    %c1_74 = arith.constant 1 : index
    %c0_75 = arith.constant 0 : index
    %c0_76 = arith.constant 0 : index
    %146 = vector.load %arg5[%c1_74, %c0_75, %c0_76] : memref<4x2x6xf32, #tpu.memory_space<vmem>>, vector<1x2x6xf32>
    %147 = vector.shape_cast %146 : vector<1x2x6xf32> to vector<2x6xf32>
    %148 = vector.shape_cast %144 : vector<2x6xf32> to vector<1x2x6xf32>
    tpu.vector_store %arg5[%c1_74, %c0_75, %c0_76], %148 {strides = array<i32>} : memref<4x2x6xf32, #tpu.memory_space<vmem>>, vector<1x2x6xf32>,
    %c1_77 = arith.constant 1 : index
    %c0_78 = arith.constant 0 : index
    %c0_79 = arith.constant 0 : index
    %149 = vector.load %arg6[%c1_77, %c0_78, %c0_79] : memref<4x2x6xf32, #tpu.memory_space<vmem>>, vector<1x2x6xf32>
    %150 = vector.shape_cast %149 : vector<1x2x6xf32> to vector<2x6xf32>
    %151 = vector.shape_cast %145 : vector<2x6xf32> to vector<1x2x6xf32>
    tpu.vector_store %arg6[%c1_77, %c0_78, %c0_79], %151 {strides = array<i32>} : memref<4x2x6xf32, #tpu.memory_space<vmem>>, vector<1x2x6xf32>,
    %c0_80 = arith.constant 0 : index
    %c2_81 = arith.constant 2 : index
    %c0_82 = arith.constant 0 : index
    %152 = vector.load %arg3[%c0_80, %c2_81, %c0_82] : memref<4x4x6xf32, #tpu.memory_space<vmem>>, vector<1x1x6xf32>
    %153 = vector.shape_cast %152 : vector<1x1x6xf32> to vector<1x6xf32>
    %c0_83 = arith.constant 0 : index
    %c2_84 = arith.constant 2 : index
    %c0_85 = arith.constant 0 : index
    %154 = vector.load %arg4[%c0_83, %c2_84, %c0_85] : memref<4x4x6xf32, #tpu.memory_space<vmem>>, vector<1x1x6xf32>
    %155 = vector.shape_cast %154 : vector<1x1x6xf32> to vector<1x6xf32>
    %156 = vector.broadcast %153 : vector<1x6xf32> to vector<2x6xf32>
    %157 = arith.mulf %1, %156 : vector<2x6xf32>
    %158 = vector.broadcast %155 : vector<1x6xf32> to vector<2x6xf32>
    %159 = arith.mulf %9, %158 : vector<2x6xf32>
    %160 = arith.subf %157, %159 : vector<2x6xf32>
    %161 = vector.broadcast %155 : vector<1x6xf32> to vector<2x6xf32>
    %162 = arith.mulf %1, %161 : vector<2x6xf32>
    %163 = vector.broadcast %153 : vector<1x6xf32> to vector<2x6xf32>
    %164 = arith.mulf %9, %163 : vector<2x6xf32>
    %165 = arith.addf %162, %164 : vector<2x6xf32>
    %c1_86 = arith.constant 1 : index
    %c2_87 = arith.constant 2 : index
    %c0_88 = arith.constant 0 : index
    %166 = vector.load %arg3[%c1_86, %c2_87, %c0_88] : memref<4x4x6xf32, #tpu.memory_space<vmem>>, vector<1x1x6xf32>
    %167 = vector.shape_cast %166 : vector<1x1x6xf32> to vector<1x6xf32>
    %c1_89 = arith.constant 1 : index
    %c2_90 = arith.constant 2 : index
    %c0_91 = arith.constant 0 : index
    %168 = vector.load %arg4[%c1_89, %c2_90, %c0_91] : memref<4x4x6xf32, #tpu.memory_space<vmem>>, vector<1x1x6xf32>
    %169 = vector.shape_cast %168 : vector<1x1x6xf32> to vector<1x6xf32>
    %170 = vector.broadcast %167 : vector<1x6xf32> to vector<2x6xf32>
    %171 = arith.mulf %3, %170 : vector<2x6xf32>
    %172 = vector.broadcast %169 : vector<1x6xf32> to vector<2x6xf32>
    %173 = arith.mulf %11, %172 : vector<2x6xf32>
    %174 = arith.subf %171, %173 : vector<2x6xf32>
    %175 = vector.broadcast %169 : vector<1x6xf32> to vector<2x6xf32>
    %176 = arith.mulf %3, %175 : vector<2x6xf32>
    %177 = vector.broadcast %167 : vector<1x6xf32> to vector<2x6xf32>
    %178 = arith.mulf %11, %177 : vector<2x6xf32>
    %179 = arith.addf %176, %178 : vector<2x6xf32>
    %180 = arith.addf %160, %174 : vector<2x6xf32>
    %181 = arith.addf %165, %179 : vector<2x6xf32>
    %c2_92 = arith.constant 2 : index
    %c2_93 = arith.constant 2 : index
    %c0_94 = arith.constant 0 : index
    %182 = vector.load %arg3[%c2_92, %c2_93, %c0_94] : memref<4x4x6xf32, #tpu.memory_space<vmem>>, vector<1x1x6xf32>
    %183 = vector.shape_cast %182 : vector<1x1x6xf32> to vector<1x6xf32>
    %c2_95 = arith.constant 2 : index
    %c2_96 = arith.constant 2 : index
    %c0_97 = arith.constant 0 : index
    %184 = vector.load %arg4[%c2_95, %c2_96, %c0_97] : memref<4x4x6xf32, #tpu.memory_space<vmem>>, vector<1x1x6xf32>
    %185 = vector.shape_cast %184 : vector<1x1x6xf32> to vector<1x6xf32>
    %186 = vector.broadcast %183 : vector<1x6xf32> to vector<2x6xf32>
    %187 = arith.mulf %5, %186 : vector<2x6xf32>
    %188 = vector.broadcast %185 : vector<1x6xf32> to vector<2x6xf32>
    %189 = arith.mulf %13, %188 : vector<2x6xf32>
    %190 = arith.subf %187, %189 : vector<2x6xf32>
    %191 = vector.broadcast %185 : vector<1x6xf32> to vector<2x6xf32>
    %192 = arith.mulf %5, %191 : vector<2x6xf32>
    %193 = vector.broadcast %183 : vector<1x6xf32> to vector<2x6xf32>
    %194 = arith.mulf %13, %193 : vector<2x6xf32>
    %195 = arith.addf %192, %194 : vector<2x6xf32>
    %196 = arith.addf %180, %190 : vector<2x6xf32>
    %197 = arith.addf %181, %195 : vector<2x6xf32>
    %c3_98 = arith.constant 3 : index
    %c2_99 = arith.constant 2 : index
    %c0_100 = arith.constant 0 : index
    %198 = vector.load %arg3[%c3_98, %c2_99, %c0_100] : memref<4x4x6xf32, #tpu.memory_space<vmem>>, vector<1x1x6xf32>
    %199 = vector.shape_cast %198 : vector<1x1x6xf32> to vector<1x6xf32>
    %c3_101 = arith.constant 3 : index
    %c2_102 = arith.constant 2 : index
    %c0_103 = arith.constant 0 : index
    %200 = vector.load %arg4[%c3_101, %c2_102, %c0_103] : memref<4x4x6xf32, #tpu.memory_space<vmem>>, vector<1x1x6xf32>
    %201 = vector.shape_cast %200 : vector<1x1x6xf32> to vector<1x6xf32>
    %202 = vector.broadcast %199 : vector<1x6xf32> to vector<2x6xf32>
    %203 = arith.mulf %7, %202 : vector<2x6xf32>
    %204 = vector.broadcast %201 : vector<1x6xf32> to vector<2x6xf32>
    %205 = arith.mulf %15, %204 : vector<2x6xf32>
    %206 = arith.subf %203, %205 : vector<2x6xf32>
    %207 = vector.broadcast %201 : vector<1x6xf32> to vector<2x6xf32>
    %208 = arith.mulf %7, %207 : vector<2x6xf32>
    %209 = vector.broadcast %199 : vector<1x6xf32> to vector<2x6xf32>
    %210 = arith.mulf %15, %209 : vector<2x6xf32>
    %211 = arith.addf %208, %210 : vector<2x6xf32>
    %212 = arith.addf %196, %206 : vector<2x6xf32>
    %213 = arith.addf %197, %211 : vector<2x6xf32>
    %c2_104 = arith.constant 2 : index
    %c0_105 = arith.constant 0 : index
    %c0_106 = arith.constant 0 : index
    %214 = vector.load %arg5[%c2_104, %c0_105, %c0_106] : memref<4x2x6xf32, #tpu.memory_space<vmem>>, vector<1x2x6xf32>
    %215 = vector.shape_cast %214 : vector<1x2x6xf32> to vector<2x6xf32>
    %216 = vector.shape_cast %212 : vector<2x6xf32> to vector<1x2x6xf32>
    tpu.vector_store %arg5[%c2_104, %c0_105, %c0_106], %216 {strides = array<i32>} : memref<4x2x6xf32, #tpu.memory_space<vmem>>, vector<1x2x6xf32>,
    %c2_107 = arith.constant 2 : index
    %c0_108 = arith.constant 0 : index
    %c0_109 = arith.constant 0 : index
    %217 = vector.load %arg6[%c2_107, %c0_108, %c0_109] : memref<4x2x6xf32, #tpu.memory_space<vmem>>, vector<1x2x6xf32>
    %218 = vector.shape_cast %217 : vector<1x2x6xf32> to vector<2x6xf32>
    %219 = vector.shape_cast %213 : vector<2x6xf32> to vector<1x2x6xf32>
    tpu.vector_store %arg6[%c2_107, %c0_108, %c0_109], %219 {strides = array<i32>} : memref<4x2x6xf32, #tpu.memory_space<vmem>>, vector<1x2x6xf32>,
    %c0_110 = arith.constant 0 : index
    %c3_111 = arith.constant 3 : index
    %c0_112 = arith.constant 0 : index
    %220 = vector.load %arg3[%c0_110, %c3_111, %c0_112] : memref<4x4x6xf32, #tpu.memory_space<vmem>>, vector<1x1x6xf32>
    %221 = vector.shape_cast %220 : vector<1x1x6xf32> to vector<1x6xf32>
    %c0_113 = arith.constant 0 : index
    %c3_114 = arith.constant 3 : index
    %c0_115 = arith.constant 0 : index
    %222 = vector.load %arg4[%c0_113, %c3_114, %c0_115] : memref<4x4x6xf32, #tpu.memory_space<vmem>>, vector<1x1x6xf32>
    %223 = vector.shape_cast %222 : vector<1x1x6xf32> to vector<1x6xf32>
    %224 = vector.broadcast %221 : vector<1x6xf32> to vector<2x6xf32>
    %225 = arith.mulf %1, %224 : vector<2x6xf32>
    %226 = vector.broadcast %223 : vector<1x6xf32> to vector<2x6xf32>
    %227 = arith.mulf %9, %226 : vector<2x6xf32>
    %228 = arith.subf %225, %227 : vector<2x6xf32>
    %229 = vector.broadcast %223 : vector<1x6xf32> to vector<2x6xf32>
    %230 = arith.mulf %1, %229 : vector<2x6xf32>
    %231 = vector.broadcast %221 : vector<1x6xf32> to vector<2x6xf32>
    %232 = arith.mulf %9, %231 : vector<2x6xf32>
    %233 = arith.addf %230, %232 : vector<2x6xf32>
    %c1_116 = arith.constant 1 : index
    %c3_117 = arith.constant 3 : index
    %c0_118 = arith.constant 0 : index
    %234 = vector.load %arg3[%c1_116, %c3_117, %c0_118] : memref<4x4x6xf32, #tpu.memory_space<vmem>>, vector<1x1x6xf32>
    %235 = vector.shape_cast %234 : vector<1x1x6xf32> to vector<1x6xf32>
    %c1_119 = arith.constant 1 : index
    %c3_120 = arith.constant 3 : index
    %c0_121 = arith.constant 0 : index
    %236 = vector.load %arg4[%c1_119, %c3_120, %c0_121] : memref<4x4x6xf32, #tpu.memory_space<vmem>>, vector<1x1x6xf32>
    %237 = vector.shape_cast %236 : vector<1x1x6xf32> to vector<1x6xf32>
    %238 = vector.broadcast %235 : vector<1x6xf32> to vector<2x6xf32>
    %239 = arith.mulf %3, %238 : vector<2x6xf32>
    %240 = vector.broadcast %237 : vector<1x6xf32> to vector<2x6xf32>
    %241 = arith.mulf %11, %240 : vector<2x6xf32>
    %242 = arith.subf %239, %241 : vector<2x6xf32>
    %243 = vector.broadcast %237 : vector<1x6xf32> to vector<2x6xf32>
    %244 = arith.mulf %3, %243 : vector<2x6xf32>
    %245 = vector.broadcast %235 : vector<1x6xf32> to vector<2x6xf32>
    %246 = arith.mulf %11, %245 : vector<2x6xf32>
    %247 = arith.addf %244, %246 : vector<2x6xf32>
    %248 = arith.addf %228, %242 : vector<2x6xf32>
    %249 = arith.addf %233, %247 : vector<2x6xf32>
    %c2_122 = arith.constant 2 : index
    %c3_123 = arith.constant 3 : index
    %c0_124 = arith.constant 0 : index
    %250 = vector.load %arg3[%c2_122, %c3_123, %c0_124] : memref<4x4x6xf32, #tpu.memory_space<vmem>>, vector<1x1x6xf32>
    %251 = vector.shape_cast %250 : vector<1x1x6xf32> to vector<1x6xf32>
    %c2_125 = arith.constant 2 : index
    %c3_126 = arith.constant 3 : index
    %c0_127 = arith.constant 0 : index
    %252 = vector.load %arg4[%c2_125, %c3_126, %c0_127] : memref<4x4x6xf32, #tpu.memory_space<vmem>>, vector<1x1x6xf32>
    %253 = vector.shape_cast %252 : vector<1x1x6xf32> to vector<1x6xf32>
    %254 = vector.broadcast %251 : vector<1x6xf32> to vector<2x6xf32>
    %255 = arith.mulf %5, %254 : vector<2x6xf32>
    %256 = vector.broadcast %253 : vector<1x6xf32> to vector<2x6xf32>
    %257 = arith.mulf %13, %256 : vector<2x6xf32>
    %258 = arith.subf %255, %257 : vector<2x6xf32>
    %259 = vector.broadcast %253 : vector<1x6xf32> to vector<2x6xf32>
    %260 = arith.mulf %5, %259 : vector<2x6xf32>
    %261 = vector.broadcast %251 : vector<1x6xf32> to vector<2x6xf32>
    %262 = arith.mulf %13, %261 : vector<2x6xf32>
    %263 = arith.addf %260, %262 : vector<2x6xf32>
    %264 = arith.addf %248, %258 : vector<2x6xf32>
    %265 = arith.addf %249, %263 : vector<2x6xf32>
    %c3_128 = arith.constant 3 : index
    %c3_129 = arith.constant 3 : index
    %c0_130 = arith.constant 0 : index
    %266 = vector.load %arg3[%c3_128, %c3_129, %c0_130] : memref<4x4x6xf32, #tpu.memory_space<vmem>>, vector<1x1x6xf32>
    %267 = vector.shape_cast %266 : vector<1x1x6xf32> to vector<1x6xf32>
    %c3_131 = arith.constant 3 : index
    %c3_132 = arith.constant 3 : index
    %c0_133 = arith.constant 0 : index
    %268 = vector.load %arg4[%c3_131, %c3_132, %c0_133] : memref<4x4x6xf32, #tpu.memory_space<vmem>>, vector<1x1x6xf32>
    %269 = vector.shape_cast %268 : vector<1x1x6xf32> to vector<1x6xf32>
    %270 = vector.broadcast %267 : vector<1x6xf32> to vector<2x6xf32>
    %271 = arith.mulf %7, %270 : vector<2x6xf32>
    %272 = vector.broadcast %269 : vector<1x6xf32> to vector<2x6xf32>
    %273 = arith.mulf %15, %272 : vector<2x6xf32>
    %274 = arith.subf %271, %273 : vector<2x6xf32>
    %275 = vector.broadcast %269 : vector<1x6xf32> to vector<2x6xf32>
    %276 = arith.mulf %7, %275 : vector<2x6xf32>
    %277 = vector.broadcast %267 : vector<1x6xf32> to vector<2x6xf32>
    %278 = arith.mulf %15, %277 : vector<2x6xf32>
    %279 = arith.addf %276, %278 : vector<2x6xf32>
    %280 = arith.addf %264, %274 : vector<2x6xf32>
    %281 = arith.addf %265, %279 : vector<2x6xf32>
    %c3_134 = arith.constant 3 : index
    %c0_135 = arith.constant 0 : index
    %c0_136 = arith.constant 0 : index
    %282 = vector.load %arg5[%c3_134, %c0_135, %c0_136] : memref<4x2x6xf32, #tpu.memory_space<vmem>>, vector<1x2x6xf32>
    %283 = vector.shape_cast %282 : vector<1x2x6xf32> to vector<2x6xf32>
    %284 = vector.shape_cast %280 : vector<2x6xf32> to vector<1x2x6xf32>
    tpu.vector_store %arg5[%c3_134, %c0_135, %c0_136], %284 {strides = array<i32>} : memref<4x2x6xf32, #tpu.memory_space<vmem>>, vector<1x2x6xf32>,
    %c3_137 = arith.constant 3 : index
    %c0_138 = arith.constant 0 : index
    %c0_139 = arith.constant 0 : index
    %285 = vector.load %arg6[%c3_137, %c0_138, %c0_139] : memref<4x2x6xf32, #tpu.memory_space<vmem>>, vector<1x2x6xf32>
    %286 = vector.shape_cast %285 : vector<1x2x6xf32> to vector<2x6xf32>
    %287 = vector.shape_cast %281 : vector<2x6xf32> to vector<1x2x6xf32>
    tpu.vector_store %arg6[%c3_137, %c0_138, %c0_139], %287 {strides = array<i32>} : memref<4x2x6xf32, #tpu.memory_space<vmem>>, vector<1x2x6xf32>,
    return
  }
  func.func @transform_0(%arg0: i32) -> (i32, i32, i32) {
    %c0_i32 = arith.constant 0 : i32
    %c0_i32_0 = arith.constant 0 : i32
    %c0_i32_1 = arith.constant 0 : i32
    return %c0_i32, %c0_i32_0, %arg0 : i32, i32, i32
  }
  func.func @transform_1(%arg0: i32) -> (i32, i32, i32) {
    %c0_i32 = arith.constant 0 : i32
    %c0_i32_0 = arith.constant 0 : i32
    %c0_i32_1 = arith.constant 0 : i32
    return %c0_i32, %c0_i32_0, %arg0 : i32, i32, i32
  }
  func.func @transform_2(%arg0: i32) -> (i32, i32, i32) {
    %c0_i32 = arith.constant 0 : i32
    %c0_i32_0 = arith.constant 0 : i32
    %c0_i32_1 = arith.constant 0 : i32
    return %c0_i32, %c0_i32_0, %arg0 : i32, i32, i32
  }
  func.func @transform_3(%arg0: i32) -> (i32, i32, i32) {
    %c0_i32 = arith.constant 0 : i32
    %c0_i32_0 = arith.constant 0 : i32
    %c0_i32_1 = arith.constant 0 : i32
    return %c0_i32, %c0_i32_0, %arg0 : i32, i32, i32
  }
  func.func @transform_4(%arg0: i32) -> (i32, i32, i32) {
    %c0_i32 = arith.constant 0 : i32
    %c0_i32_0 = arith.constant 0 : i32
    %c0_i32_1 = arith.constant 0 : i32
    return %c0_i32, %c0_i32_0, %arg0 : i32, i32, i32
  }
  func.func @transform_5(%arg0: i32) -> (i32, i32, i32) {
    %c0_i32 = arith.constant 0 : i32
    %c0_i32_0 = arith.constant 0 : i32
    %c0_i32_1 = arith.constant 0 : i32
    return %c0_i32, %c0_i32_0, %arg0 : i32, i32, i32
  }
}

</mosaic_0001>

<bundles_post_ra>
// kernel: tpu_custom_call.1
= control target key start
LH: loop header
LB: loop body
LE: loop exit
PB: predicated region body
PF: predicated region fallthrough
CT: control target
= control target key end

     0   :  { %11 = vsyncpa [#allocation3], 0  ;;  %s829_s0 = inlined_call_operand.hbm [shape: f32[4,2,6], index: 0, kind: input, shape index: {}]   ;;  %s830_s1 = inlined_call_operand.hbm [shape: f32[4,2,6], index: 1, kind: input, shape index: {}]   ;;  %s831_s2 = inlined_call_operand.hbm [shape: f32[4,4,6], index: 2, kind: input, shape index: {}]   ;;  %s832_s3 = inlined_call_operand.hbm [shape: f32[4,4,6], index: 3, kind: input, shape index: {}]   ;;  %s833_s4 = inlined_call_operand.hbm [shape: f32[4,2,6], index: 4, kind: output, shape index: {0}]   ;;  %s834_s5 = inlined_call_operand.hbm [shape: f32[4,2,6], index: 5, kind: output, shape index: {1}]  }
   0x1   :  { %12 = vsyncpa [#allocation6], 0 }
   0x2   :  { %13 = vsyncpa [#allocation9], 0 }
   0x3   :  { %14 = vsyncpa [#allocation4], 0 }
   0x4   :  { %15 = vsyncpa [#allocation12], 0  ;;  %s610_s18 = smov [#allocation5]   ;;  %s611_s20 = smov [#allocation2]  }
   0x5   :  { %s33_s19 = sshll.u32 %s610_s18, 4  ;;  %s21_s21 = sshll.u32 %s611_s20, 4  ;;  %s34_s19 = int_to_ptr.vmem [resolvable:$true] %s33_s19  ;;  %s650_s21 = int_to_ptr.vmem [resolvable:$true] %s21_s21 }
   0x6   :  { %s468_s24 = scalar_lea.hbm %s830_s1, 128 }
   0x7   :  { %p469_p0 = scmp.ne.s32.totalorder %s830_s1, %s468_s24  ;;  %p472_p1 = scmp.lt.u32.totalorder %s468_s24, %s830_s1 }
   0x9   :  { %p474_p2 = pnand %p472_p1, %p469_p0 }
   0xb   :  { %477 = shalt.err (!%p474_p2)
}
   0xc   :  { %s478_s29 = scalar_lea.vmem %s34_s19, 128  ;;  %p483_p4 = scmp.lt.s32.totalorder %s34_s19, %s34_s19 }
   0xd   :  { %p479_p3 = scmp.ne.s32.totalorder %s34_s19, %s478_s29  ;;  %p484_p5 = scmp.lt.s32.totalorder %s478_s29, %s478_s29 }
   0xf   :  { %p485_p6 = por %p484_p5, %p483_p4 }
  0x11   :  { %p486_p7 = pnand %p485_p6, %p479_p3 }
  0x13   :  { %489 = shalt.err (!%p486_p7)
}
  0x14   :  { %s612_s30 = smov 32   ;;  %s613_s6 = smov 2  }
  0x15   :  { %39 = dma.hbm_to_vmem [thread:$0]  %s830_s1, 128, %s34_s19, [#allocation6], %s612_s30, %s612_s30, %s613_s6  }
  0x16   :  { %s490_s11 = scalar_lea.hbm %s829_s0, 128 }
  0x17   :  { %p491_p8 = scmp.ne.s32.totalorder %s829_s0, %s490_s11  ;;  %p494_p9 = scmp.lt.u32.totalorder %s490_s11, %s829_s0 }
  0x19   :  { %p496_p10 = pnand %p494_p9, %p491_p8 }
  0x1b   :  { %499 = shalt.err (!%p496_p10)
}
  0x1c   :  { %s500_s16 = scalar_lea.vmem %s650_s21, 128  ;;  %p505_p12 = scmp.lt.s32.totalorder %s650_s21, %s650_s21 }
  0x1d   :  { %p501_p11 = scmp.ne.s32.totalorder %s650_s21, %s500_s16  ;;  %p506_p13 = scmp.lt.s32.totalorder %s500_s16, %s500_s16 }
  0x1f   :  { %p507_p0 = por %p506_p13, %p505_p12 }
  0x21   :  { %p508_p1 = pnand %p507_p0, %p501_p11 }
  0x23   :  { %511 = shalt.err (!%p508_p1)
}
  0x24   :  { %27 = dma.hbm_to_vmem [thread:$0]  %s829_s0, 128, %s650_s21, [#allocation3], %s612_s30, %s612_s30, %s613_s6  }
  0x25   :  { %s614_s18 = smov [#allocation7]   ;;  %s512_s23 = scalar_lea.hbm %s831_s2, 256 }
  0x26   :  { %s45_s19 = sshll.u32 %s614_s18, 4  ;;  %p513_p2 = scmp.ne.s32.totalorder %s831_s2, %s512_s23  ;;  %s46_s19 = int_to_ptr.vmem [resolvable:$true] %s45_s19 }
  0x27   :  { %p516_p3 = scmp.lt.u32.totalorder %s512_s23, %s831_s2 }
  0x29   :  { %p518_p4 = pnand %p516_p3, %p513_p2 }
  0x2b   :  { %521 = shalt.err (!%p518_p4)
}
  0x2c   :  { %s522_s28 = scalar_lea.vmem %s46_s19, 256  ;;  %p527_p6 = scmp.lt.s32.totalorder %s46_s19, %s46_s19 }
  0x2d   :  { %p523_p5 = scmp.ne.s32.totalorder %s46_s19, %s522_s28  ;;  %p528_p7 = scmp.lt.s32.totalorder %s522_s28, %s522_s28 }
  0x2f   :  { %p529_p8 = por %p528_p7, %p527_p6 }
  0x31   :  { %p530_p9 = pnand %p529_p8, %p523_p5 }
  0x33   :  { %533 = shalt.err (!%p530_p9)
}
  0x34   :  { %s615_s0 = smov 64   ;;  %s616_s21 = smov 4  }
  0x35   :  { %51 = dma.hbm_to_vmem [thread:$0]  %s831_s2, 256, %s46_s19, [#allocation6], %s615_s0, %s615_s0, %s616_s21  }
  0x36   :  { %s617_s8 = smov [#allocation8]   ;;  %s534_s12 = scalar_lea.hbm %s832_s3, 256 }
  0x37   :  { %s57_s9 = sshll.u32 %s617_s8, 4  ;;  %p535_p10 = scmp.ne.s32.totalorder %s832_s3, %s534_s12  ;;  %s58_s9 = int_to_ptr.vmem [resolvable:$true] %s57_s9 }
  0x38   :  { %p538_p11 = scmp.lt.u32.totalorder %s534_s12, %s832_s3 }
  0x3a   :  { %p540_p12 = pnand %p538_p11, %p535_p10 }
  0x3c   :  { %543 = shalt.err (!%p540_p12)
}
  0x3d   :  { %s544_s1 = scalar_lea.vmem %s58_s9, 256  ;;  %p549_p0 = scmp.lt.s32.totalorder %s58_s9, %s58_s9 }
  0x3e   :  { %p545_p13 = scmp.ne.s32.totalorder %s58_s9, %s544_s1  ;;  %p550_p1 = scmp.lt.s32.totalorder %s544_s1, %s544_s1 }
  0x40   :  { %p551_p2 = por %p550_p1, %p549_p0 }
  0x42   :  { %p552_p3 = pnand %p551_p2, %p545_p13 }
  0x44   :  { %555 = shalt.err (!%p552_p3)
}
  0x45   :  { %63 = dma.hbm_to_vmem [thread:$0]  %s832_s3, 256, %s58_s9, [#allocation9], %s615_s0, %s615_s0, %s616_s21  }
  0x46   :  { %600 = dma.done.wait [#allocation3], 128  }
  0x47   :  { %601 = vsyncadd [#allocation3], 4294967168 }
  0x48   :  { %602 = dma.done.wait [#allocation6], 384  }
  0x49   :  { %603 = vsyncadd [#allocation6], 4294966912 }
  0x4a   :  { %604 = dma.done.wait [#allocation9], 256  }
  0x4b   :  { %605 = vsyncadd [#allocation9], 4294967040  ;;  %v711_v0 = vld [vmem:[#allocation2] sm:$0x3]  ;;  %v713_v1 = vld [vmem:[#allocation2 + $0x2] sm:$0x3] }
  0x4c   :  { %v715_v2 = vld [vmem:[#allocation2 + $0x4] sm:$0x3]  ;;  %v717_v3 = vld [vmem:[#allocation2 + $0x6] sm:$0x3]  ;;  %v719_v4 = vld [vmem:[#allocation5] sm:$0x3] }
  0x4d   :  { %v721_v5 = vld [vmem:[#allocation5 + $0x2] sm:$0x3]  ;;  %v723_v6 = vld [vmem:[#allocation5 + $0x4] sm:$0x3]  ;;  %v725_v7 = vld [vmem:[#allocation5 + $0x6] sm:$0x3] }
  0x4e   :  { %v426_v8 = vld [vmem:[#allocation7] ss:$0 sm:$0xff]  ;;  %v427_v9 = vld [vmem:[#allocation8] ss:$0 sm:$0xff]  ;;  %v428_v11 = vld [vmem:[#allocation7 + $0x4] ss:$0 sm:$0xff] }
  0x4f   :  { %v96_v10 = vmul.f32 %v426_v8, %v711_v0  ;;  %v429_v12 = vld [vmem:[#allocation8 + $0x4] ss:$0 sm:$0xff]  ;;  %vm166_vm0 = vcmask 41984   ;;  %v104_v13 = vmul.f32 %v426_v8, %v719_v4  ;;  %v101_v14 = vmul.f32 %v427_v9, %v719_v4  ;;  %v430_v17 = vld [vmem:[#allocation7 + $0x8] ss:$0 sm:$0xff]  ;;  %s618_s3 = smov [#allocation10]  }
  0x50   :  { %v114_v15 = vmul.f32 %v428_v11, %v713_v1  ;;  %v119_v16 = vmul.f32 %v429_v12, %v721_v5  ;;  %v431_v18 = vld [vmem:[#allocation8 + $0x8] ss:$0 sm:$0xff]  ;;  %v432_v19 = vld [vmem:[#allocation7 + $0xc] ss:$0 sm:$0xff]  ;;  %v103_v20 = vmul.f32 %v427_v9, %v711_v0  ;;  %v134_v21 = vmul.f32 %v430_v17, %v715_v2  ;;  %v433_v23 = vld [vmem:[#allocation8 + $0xc] ss:$0 sm:$0xff] }
  0x51   :  { %v139_v22 = vmul.f32 %v431_v18, %v723_v6  ;;  %v154_v24 = vmul.f32 %v432_v19, %v717_v3  ;;  %v121_v25 = vmul.f32 %v429_v12, %v713_v1  ;;  %v102_v26 = vsub.f32 %v96_v10, %v101_v14  ;;  %v434_v30 = vld [vmem:[#allocation7 + $0x1] ss:$0 sm:$0xff]  ;;  %v435_v31 = vld [vmem:[#allocation8 + $0x1] ss:$0 sm:$0xff]  ;;  %v436_v36 = vld [vmem:[#allocation7 + $0x5] ss:$0 sm:$0xff] }
  0x52   :  { %v120_v27 = vsub.f32 %v114_v15, %v119_v16  ;;  %v159_v28 = vmul.f32 %v433_v23, %v725_v7  ;;  %v105_v29 = vadd.f32 %v104_v13, %v103_v20  ;;  %v122_v33 = vmul.f32 %v428_v11, %v721_v5  ;;  %v437_v37 = vld [vmem:[#allocation8 + $0x5] ss:$0 sm:$0xff]  ;;  %v438_v42 = vld [vmem:[#allocation7 + $0x9] ss:$0 sm:$0xff]  ;;  %v439_v43 = vld [vmem:[#allocation8 + $0x9] ss:$0 sm:$0xff] }
  0x53   :  { %v140_v32 = vsub.f32 %v134_v21, %v139_v22  ;;  %v141_v34 = vmul.f32 %v431_v18, %v715_v2  ;;  %v142_v35 = vmul.f32 %v430_v17, %v723_v6  ;;  %v161_v40 = vmul.f32 %v433_v23, %v717_v3  ;;  %v440_v48 = vld [vmem:[#allocation7 + $0xd] ss:$0 sm:$0xff]  ;;  %v441_v49 = vld [vmem:[#allocation8 + $0xd] ss:$0 sm:$0xff]  ;;  %v442_v14 = vld [vmem:[#allocation7 + $0x2] ss:$0 sm:$0xff] }
  0x54   :  { %v124_v38 = vadd.f32 %v120_v27, %v102_v26  ;;  %v160_v39 = vsub.f32 %v154_v24, %v159_v28  ;;  %v162_v41 = vmul.f32 %v432_v19, %v725_v7  ;;  %v123_v44 = vadd.f32 %v122_v33, %v121_v25  ;;  %v443_v15 = vld [vmem:[#allocation8 + $0x2] ss:$0 sm:$0xff]  ;;  %v444_v16 = vld [vmem:[#allocation7 + $0x6] ss:$0 sm:$0xff]  ;;  %v445_v21 = vld [vmem:[#allocation8 + $0x6] ss:$0 sm:$0xff] }
  0x55   :  { %v143_v45 = vadd.f32 %v142_v35, %v141_v34  ;;  %v175_v46 = vmul.f32 %v434_v30, %v711_v0  ;;  %v180_v47 = vmul.f32 %v435_v31, %v719_v4  ;;  %v191_v52 = vmul.f32 %v436_v36, %v713_v1  ;;  %v446_v26 = vld [vmem:[#allocation7 + $0xa] ss:$0 sm:$0xff]  ;;  %v447_v27 = vld [vmem:[#allocation8 + $0xa] ss:$0 sm:$0xff]  ;;  %v448_v28 = vld [vmem:[#allocation7 + $0xe] ss:$0 sm:$0xff] }
  0x56   :  { %v144_v50 = vadd.f32 %v140_v32, %v124_v38  ;;  %v163_v51 = vadd.f32 %v162_v41, %v161_v40  ;;  %v196_v53 = vmul.f32 %v437_v37, %v721_v5  ;;  %v125_v54 = vadd.f32 %v123_v44, %v105_v29  ;;  %v449_v33 = vld [vmem:[#allocation8 + $0xe] ss:$0 sm:$0xff]  ;;  %s396_s18 = sshll.u32 %s618_s3, 4  ;;  %s619_s19 = smov [#allocation11]   ;;  %s397_s18 = int_to_ptr.vmem [resolvable:$true] %s396_s18 }
  0x57   :  { %v181_v55 = vsub.f32 %v175_v46, %v180_v47  ;;  %v209_v56 = vmul.f32 %v438_v42, %v715_v2  ;;  %v214_v57 = vmul.f32 %v439_v43, %v723_v6  ;;  %v227_v60 = vmul.f32 %v440_v48, %v717_v3  ;;  %s408_s20 = sshll.u32 %s619_s19, 4  ;;  %s556_s22 = scalar_lea.vmem %s397_s18, 128  ;;  %s409_s20 = int_to_ptr.vmem [resolvable:$true] %s408_s20 }
  0x58   :  { %v164_v58 = vadd.f32 %v160_v39, %v144_v50  ;;  %v197_v59 = vsub.f32 %v191_v52, %v196_v53  ;;  %v232_v61 = vmul.f32 %v441_v49, %v725_v7  ;;  %v145_v62 = vadd.f32 %v143_v45, %v125_v54  ;;  %v450_v50 = vld [vmem:[#allocation7 + $0x3] ss:$0 sm:$0xff]  ;;  %p557_p4 = scmp.ne.s32.totalorder %s397_s18, %s556_s22  ;;  %p561_p5 = scmp.lt.s32.totalorder %s397_s18, %s397_s18 }
  0x59   :  { %v215_v63 = vsub.f32 %v209_v56, %v214_v57  ;;  %v182_v8 = vmul.f32 %v435_v31, %v711_v0  ;;  %v183_v9 = vmul.f32 %v434_v30, %v719_v4  ;;  %v198_v12 = vmul.f32 %v437_v37, %v713_v1  ;;  %v452_v56 = vld [vmem:[#allocation7 + $0x7] ss:$0 sm:$0xff]  ;;  %v453_v57 = vld [vmem:[#allocation8 + $0x7] ss:$0 sm:$0xff]  ;;  %p562_p6 = scmp.lt.s32.totalorder %s556_s22, %s556_s22 }
  0x5a   :  { %167 = vst.msk [vmem:[#allocation10] sm:$0x3] %vm166_vm0, %v164_v58  ;;  %v201_v10 = vadd.f32 %v197_v59, %v181_v55  ;;  %v233_v11 = vsub.f32 %v227_v60, %v232_v61  ;;  %v199_v13 = vmul.f32 %v436_v36, %v721_v5  ;;  %v165_v17 = vadd.f32 %v163_v51, %v145_v62  ;;  %v451_v51 = vld [vmem:[#allocation8 + $0x3] ss:$0 sm:$0xff]  ;;  %v454_v62 = vld [vmem:[#allocation7 + $0xb] ss:$0 sm:$0xff] }
  0x5b   :  { %v184_v18 = vadd.f32 %v183_v9, %v182_v8  ;;  %v216_v19 = vmul.f32 %v439_v43, %v715_v2  ;;  %v217_v20 = vmul.f32 %v438_v42, %v723_v6  ;;  %v234_v24 = vmul.f32 %v441_v49, %v717_v3  ;;  %p563_p7 = por %p562_p6, %p561_p5 }
  0x5c   :  { %v219_v22 = vadd.f32 %v215_v63, %v201_v10  ;;  %v200_v23 = vadd.f32 %v199_v13, %v198_v12  ;;  %v235_v25 = vmul.f32 %v440_v48, %v725_v7  ;;  %168 = vst.msk [vmem:[#allocation11] sm:$0x3] %vm166_vm0, %v165_v17  ;;  %v249_v30 = vmul.f32 %v442_v14, %v711_v0  ;;  %v456_v12 = vld [vmem:[#allocation7 + $0xf] ss:$0 sm:$0xff]  ;;  %v457_v17 = vld [vmem:[#allocation8 + $0xf] ss:$0 sm:$0xff] }
  0x5d   :  { %v218_v29 = vadd.f32 %v217_v20, %v216_v19  ;;  %v254_v31 = vmul.f32 %v443_v15, %v719_v4  ;;  %v265_v32 = vmul.f32 %v444_v16, %v713_v1  ;;  %v270_v37 = vmul.f32 %v445_v21, %v721_v5  ;;  %p564_p8 = pnand %p563_p7, %p557_p4 }
  0x5e   :  { %v237_v34 = vadd.f32 %v233_v11, %v219_v22  ;;  %v202_v35 = vadd.f32 %v200_v23, %v184_v18  ;;  %v236_v36 = vadd.f32 %v235_v25, %v234_v24  ;;  %v283_v39 = vmul.f32 %v446_v26, %v715_v2  ;;  %v455_v11 = vld [vmem:[#allocation8 + $0xb] ss:$0 sm:$0xff] }
  0x5f   :  { %v255_v38 = vsub.f32 %v249_v30, %v254_v31  ;;  %v288_v40 = vmul.f32 %v447_v27, %v723_v6  ;;  %v301_v41 = vmul.f32 %v448_v28, %v717_v3  ;;  %v271_v43 = vsub.f32 %v265_v32, %v270_v37 }
  0x60   :  { %240 = vst.msk [vmem:[#allocation10 + $0x2] sm:$0x3] %vm166_vm0, %v237_v34  ;;  %v220_v42 = vadd.f32 %v218_v29, %v202_v35  ;;  %v306_v44 = vmul.f32 %v449_v33, %v725_v7  ;;  %v256_v45 = vmul.f32 %v443_v15, %v711_v0  ;;  %v257_v47 = vmul.f32 %v442_v14, %v719_v4 }
  0x61   :  { %v289_v46 = vsub.f32 %v283_v39, %v288_v40  ;;  %v272_v48 = vmul.f32 %v445_v21, %v713_v1  ;;  %v273_v49 = vmul.f32 %v444_v16, %v721_v5  ;;  %v275_v53 = vadd.f32 %v271_v43, %v255_v38 }
  0x62   :  { %v238_v52 = vadd.f32 %v236_v36, %v220_v42  ;;  %v307_v54 = vsub.f32 %v301_v41, %v306_v44  ;;  %v290_v55 = vmul.f32 %v447_v27, %v715_v2  ;;  %v258_v58 = vadd.f32 %v257_v47, %v256_v45 }
  0x63   :  { %v274_v59 = vadd.f32 %v273_v49, %v272_v48  ;;  %v291_v60 = vmul.f32 %v446_v26, %v723_v6  ;;  %v308_v61 = vmul.f32 %v449_v33, %v717_v3  ;;  %v293_v63 = vadd.f32 %v289_v46, %v275_v53 }
  0x64   :  { %242 = vst.msk [vmem:[#allocation11 + $0x2] sm:$0x3] %vm166_vm0, %v238_v52  ;;  %v309_v8 = vmul.f32 %v448_v28, %v725_v7  ;;  %v323_v9 = vmul.f32 %v450_v50, %v711_v0  ;;  %v328_v10 = vmul.f32 %v451_v51, %v719_v4  ;;  %v339_v15 = vmul.f32 %v452_v56, %v713_v1 }
  0x65   :  { %v276_v13 = vadd.f32 %v274_v59, %v258_v58  ;;  %v292_v14 = vadd.f32 %v291_v60, %v290_v55  ;;  %v344_v16 = vmul.f32 %v453_v57, %v721_v5  ;;  %v311_v18 = vadd.f32 %v307_v54, %v293_v63 }
  0x66   :  { %v310_v19 = vadd.f32 %v309_v8, %v308_v61  ;;  %v329_v20 = vsub.f32 %v323_v9, %v328_v10  ;;  %v357_v21 = vmul.f32 %v454_v62, %v715_v2  ;;  %v362_v24 = vmul.f32 %v455_v11, %v723_v6 }
  0x67   :  { %v294_v22 = vadd.f32 %v292_v14, %v276_v13  ;;  %v345_v23 = vsub.f32 %v339_v15, %v344_v16  ;;  %v375_v25 = vmul.f32 %v456_v12, %v717_v3  ;;  %314 = vst.msk [vmem:[#allocation10 + $0x4] sm:$0x3] %vm166_vm0, %v311_v18  ;;  %v380_v26 = vmul.f32 %v457_v17, %v725_v7 }
  0x68   :  { %v330_v27 = vmul.f32 %v451_v51, %v711_v0  ;;  %v331_v28 = vmul.f32 %v450_v50, %v719_v4  ;;  %v346_v29 = vmul.f32 %v453_v57, %v713_v1  ;;  %v363_v32 = vsub.f32 %v357_v21, %v362_v24 }
  0x69   :  { %v312_v30 = vadd.f32 %v310_v19, %v294_v22  ;;  %v349_v31 = vadd.f32 %v345_v23, %v329_v20  ;;  %v347_v33 = vmul.f32 %v452_v56, %v721_v5  ;;  %v381_v34 = vsub.f32 %v375_v25, %v380_v26 }
  0x6a   :  { %v332_v35 = vadd.f32 %v331_v28, %v330_v27  ;;  %v364_v36 = vmul.f32 %v455_v11, %v715_v2  ;;  %v365_v37 = vmul.f32 %v454_v62, %v723_v6  ;;  %v382_v4 = vmul.f32 %v457_v17, %v717_v3 }
  0x6b   :  { %316 = vst.msk [vmem:[#allocation11 + $0x4] sm:$0x3] %vm166_vm0, %v312_v30  ;;  %v367_v0 = vadd.f32 %v363_v32, %v349_v31  ;;  %v348_v38 = vadd.f32 %v347_v33, %v346_v29  ;;  %v383_v1 = vmul.f32 %v456_v12, %v725_v7 }
  0x6c   :  { %v366_v39 = vadd.f32 %v365_v37, %v364_v36 }
  0x6d   :  { %v385_v40 = vadd.f32 %v381_v34, %v367_v0  ;;  %v350_v41 = vadd.f32 %v348_v38, %v332_v35  ;;  %v384_v5 = vadd.f32 %v383_v1, %v382_v4 }
  0x6f   :  { %388 = vst.msk [vmem:[#allocation10 + $0x6] sm:$0x3] %vm166_vm0, %v385_v40  ;;  %v368_v2 = vadd.f32 %v366_v39, %v350_v41 }
  0x70   :  { %567 = shalt.err (!%p564_p8)
}
  0x71   :  { %s568_s25 = scalar_lea.hbm %s833_s4, 128 }
  0x72   :  { %p569_p9 = scmp.ne.s32.totalorder %s833_s4, %s568_s25  ;;  %p572_p10 = scmp.lt.u32.totalorder %s568_s25, %s833_s4 }
  0x74   :  { %p574_p11 = pnand %p572_p10, %p569_p9 }
  0x76   :  { %577 = shalt.err (!%p574_p11)
}
  0x77   :  { %402 = dma.vmem_to_hbm [thread:$0]  %s397_s18, 128, %s833_s4, [#allocation4], %s612_s30, %s612_s30, %s613_s6   ;;  %v386_v3 = vadd.f32 %v384_v5, %v368_v2 }
  0x78   :  { %s578_s7 = scalar_lea.vmem %s409_s20, 128  ;;  %p583_p13 = scmp.lt.s32.totalorder %s409_s20, %s409_s20 }
  0x79   :  { %390 = vst.msk [vmem:[#allocation11 + $0x6] sm:$0x3] %vm166_vm0, %v386_v3  ;;  %p579_p12 = scmp.ne.s32.totalorder %s409_s20, %s578_s7  ;;  %p584_p0 = scmp.lt.s32.totalorder %s578_s7, %s578_s7 }
  0x7b   :  { %p585_p1 = por %p584_p0, %p583_p13 }
  0x7d   :  { %p586_p2 = pnand %p585_p1, %p579_p12 }
  0x7f   :  { %589 = shalt.err (!%p586_p2)
}
  0x80   :  { %s590_s10 = scalar_lea.hbm %s834_s5, 128 }
  0x81   :  { %p591_p3 = scmp.ne.s32.totalorder %s834_s5, %s590_s10  ;;  %p594_p4 = scmp.lt.u32.totalorder %s590_s10, %s834_s5 }
  0x83   :  { %p596_p5 = pnand %p594_p4, %p591_p3 }
  0x85   :  { %599 = shalt.err (!%p596_p5)
}
  0x86   :  { %414 = dma.vmem_to_hbm [thread:$0]  %s409_s20, 128, %s834_s5, [#allocation12], %s612_s30, %s612_s30, %s613_s6  }
  0x87   :  { %606 = dma.done.wait [#allocation4], 128  }
  0x88   :  { %607 = vsyncadd [#allocation4], 4294967168 }
  0x89   :  { %608 = dma.done.wait [#allocation12], 128  }
  0x8a   :  { %609 = vsyncadd [#allocation12], 4294967168 }
  0x8b   :  { %421 = vsyncpa [#allocation3], 1 }
  0x8c   :  { %422 = vsyncpa [#allocation6], 1 }
  0x8d   :  { %423 = vsyncpa [#allocation9], 1 }
  0x8e   :  { %424 = vsyncpa [#allocation4], 1 }
  0x8f   :  { %425 = vsyncpa [#allocation12], 1 }

</bundles_post_ra>
